<compile_context>
chip_gen: v7x
topology: tpu7x:2x2x1
jax: 0.10.0
libtpu: 0.0.40
codegen_flags: <defaults>
</compile_context>

<pallas_src>
import jax
import jax.numpy as jnp
from jax.experimental import pallas as pl
from jax.experimental.pallas import tpu as pltpu

EPS = 1e-06
_LANE = 128
_SUBLANE = 8
# ~1 MiB per f32 input block.
_TARGET_BLOCK_ELEMS = 256 * 1024


def _rmse_kernel(x_ref, y_ref, o_ref):
    x = x_ref[...].astype(jnp.float32)
    y = y_ref[...].astype(jnp.float32)
    diff = x - y
    o_ref[...] = jnp.sqrt(diff * diff + jnp.float32(EPS)).astype(o_ref.dtype)


def rmse_loss(x: jax.Array, y: jax.Array) -> jax.Array:
    assert x.shape == y.shape and x.dtype == y.dtype
    orig_shape = x.shape
    n = x.size

    xf = x.reshape(-1)
    yf = y.reshape(-1)

    # Pad only when unavoidable (flat size not a multiple of 128 lanes).
    pad = (-n) % _LANE
    if pad:
        xf = jnp.pad(xf, (0, pad))
        yf = jnp.pad(yf, (0, pad))
    n_pad = n + pad

    # Widest lane-dense last dim that divides the flat size while keeping at
    # least 8 rows (full sublane utilization). Falls back to 128 lanes.
    width = _LANE
    for cand in (4096, 2048, 1024, 512, 256):
        if n_pad % cand == 0 and n_pad // cand >= _SUBLANE:
            width = cand
            break
    rows = n_pad // width

    # ~1 MiB blocks per input, row count a multiple of 8; the ragged last
    # block (if any) is handled by the cdiv grid with masked writes.
    block_rows = max(_SUBLANE, (_TARGET_BLOCK_ELEMS // width) // _SUBLANE * _SUBLANE)
    block_rows = min(block_rows, rows)
    grid = (pl.cdiv(rows, block_rows),)

    xf = xf.reshape(rows, width)
    yf = yf.reshape(rows, width)

    itemsize = jnp.dtype(x.dtype).itemsize
    cost = pl.CostEstimate(
        flops=3 * n_pad,
        transcendentals=n_pad,          # sqrt
        bytes_accessed=3 * n_pad * itemsize,
    )

    out = pl.pallas_call(
        _rmse_kernel,
        out_shape=jax.ShapeDtypeStruct((rows, width), x.dtype),
        grid=grid,
        in_specs=[
            pl.BlockSpec((block_rows, width), lambda i: (i, 0)),
            pl.BlockSpec((block_rows, width), lambda i: (i, 0)),
        ],
        out_specs=pl.BlockSpec((block_rows, width), lambda i: (i, 0)),
        compiler_params=pltpu.CompilerParams(
            dimension_semantics=("parallel",),
        ),
        cost_estimate=cost,
    )(xf, yf)

    if pad:
        return out.reshape(-1)[:n].reshape(orig_shape)
    return out.reshape(orig_shape)


if __name__ == "__main__":
    key = jax.random.PRNGKey(0)
    kx, ky = jax.random.split(key)
    # NCHW inputs, as the PyTorch module would receive from a conv pipeline.
    x = jax.random.normal(kx, (2, 4, 16, 16), dtype=jnp.float32)
    y = jax.random.normal(ky, (2, 4, 16, 16), dtype=jnp.float32)

    out = rmse_loss(x, y)
    jax.block_until_ready(out)

    # Reference check in plain JAX.
    ref = jnp.sqrt((x - y) ** 2 + EPS)
    assert out.shape == x.shape
    assert out.dtype == x.dtype
    assert jnp.allclose(out, ref, atol=1e-6, rtol=1e-6)

    print("KERNEL_OK")
</pallas_src>

<mosaic_0001>
module attributes {stable_mosaic.version = 11 : i64} {
  func.func @_rmse_kernel(%arg0: i32, %arg1: memref<8x256xf32, #tpu.memory_space<vmem>>, %arg2: memref<8x256xf32, #tpu.memory_space<vmem>>, %arg3: memref<8x256xf32, #tpu.memory_space<vmem>>) attributes {dimension_semantics = [#tpu.dimension_semantics<parallel>], iteration_bounds = array<i64: 1>, scalar_prefetch = 0 : i64, scratch_operands = 0 : i64, tpu.core_type = #tpu.core_type<tc>, window_params = [{transform_indices = @transform_0, window_bounds = array<i64: 8, 256>}, {transform_indices = @transform_1, window_bounds = array<i64: 8, 256>}, {transform_indices = @transform_2, window_bounds = array<i64: 8, 256>}]} {
    %c0 = arith.constant 0 : index
    %c0_0 = arith.constant 0 : index
    %0 = vector.load %arg1[%c0, %c0_0] : memref<8x256xf32, #tpu.memory_space<vmem>>, vector<8x256xf32>
    %c0_1 = arith.constant 0 : index
    %c0_2 = arith.constant 0 : index
    %1 = vector.load %arg2[%c0_1, %c0_2] : memref<8x256xf32, #tpu.memory_space<vmem>>, vector<8x256xf32>
    %2 = arith.subf %0, %1 : vector<8x256xf32>
    %3 = arith.mulf %2, %2 : vector<8x256xf32>
    %cst = arith.constant 9.99999997E-7 : f32
    %4 = vector.broadcast %cst : f32 to vector<8x256xf32>
    %5 = arith.addf %3, %4 : vector<8x256xf32>
    %6 = math.sqrt %5 : vector<8x256xf32>
    %c0_3 = arith.constant 0 : index
    %c0_4 = arith.constant 0 : index
    %7 = vector.load %arg3[%c0_3, %c0_4] : memref<8x256xf32, #tpu.memory_space<vmem>>, vector<8x256xf32>
    tpu.vector_store %arg3[%c0_3, %c0_4], %6 {strides = array<i32>} : memref<8x256xf32, #tpu.memory_space<vmem>>, vector<8x256xf32>,
    return
  }
  func.func @transform_0(%arg0: i32) -> (i32, i32) {
    %c0_i32 = arith.constant 0 : i32
    %c0_i32_0 = arith.constant 0 : i32
    return %arg0, %c0_i32 : i32, i32
  }
  func.func @transform_1(%arg0: i32) -> (i32, i32) {
    %c0_i32 = arith.constant 0 : i32
    %c0_i32_0 = arith.constant 0 : i32
    return %arg0, %c0_i32 : i32, i32
  }
  func.func @transform_2(%arg0: i32) -> (i32, i32) {
    %c0_i32 = arith.constant 0 : i32
    %c0_i32_0 = arith.constant 0 : i32
    return %arg0, %c0_i32 : i32, i32
  }
}

</mosaic_0001>

<bundles_post_ra>
// kernel: tpu_custom_call.1
= control target key start
LH: loop header
LB: loop body
LE: loop exit
PB: predicated region body
PF: predicated region fallthrough
CT: control target
= control target key end

     0   :  { %7 = vsyncpa [#allocation3], 0  ;;  %s211_s0 = inlined_call_operand.hbm [shape: f32[8,256], index: 0, kind: input, shape index: {}]   ;;  %s212_s1 = inlined_call_operand.hbm [shape: f32[8,256], index: 1, kind: input, shape index: {}]   ;;  %s213_s2 = inlined_call_operand.hbm [shape: f32[8,256], index: 2, kind: output, shape index: {}]  }
   0x1   :  { %8 = vsyncpa [#allocation6], 0 }
   0x2   :  { %9 = vsyncpa [#allocation4], 0  ;;  %s157_s9 = smov [#allocation2]   ;;  %s158_s11 = smov [#allocation5]  }
   0x3   :  { %s16_s10 = sshll.u32 %s157_s9, 4  ;;  %s26_s12 = sshll.u32 %s158_s11, 4  ;;  %s17_s10 = int_to_ptr.vmem [resolvable:$true] %s16_s10  ;;  %s27_s12 = int_to_ptr.vmem [resolvable:$true] %s26_s12 }
   0x4   :  { %s85_s15 = scalar_lea.hbm %s211_s0, 256 }
   0x5   :  { %p86_p0 = scmp.ne.s32.totalorder %s211_s0, %s85_s15  ;;  %p89_p1 = scmp.lt.u32.totalorder %s85_s15, %s211_s0 }
   0x7   :  { %p91_p2 = pnand %p89_p1, %p86_p0 }
   0x9   :  { %94 = shalt.err (!%p91_p2)
}
   0xa   :  { %s95_s20 = scalar_lea.vmem %s17_s10, 256  ;;  %p100_p4 = scmp.lt.s32.totalorder %s17_s10, %s17_s10 }
   0xb   :  { %p96_p3 = scmp.ne.s32.totalorder %s17_s10, %s95_s20  ;;  %p101_p5 = scmp.lt.s32.totalorder %s95_s20, %s95_s20 }
   0xd   :  { %p102_p6 = por %p101_p5, %p100_p4 }
   0xf   :  { %p103_p7 = pnand %p102_p6, %p96_p3 }
  0x11   :  { %106 = shalt.err (!%p103_p7)
}
  0x12   :  { %19 = dma.hbm_to_vmem [thread:$0]  %s211_s0, 256, %s17_s10, [#allocation3]  }
  0x13   :  { %s107_s25 = scalar_lea.hbm %s212_s1, 256 }
  0x14   :  { %p108_p8 = scmp.ne.s32.totalorder %s212_s1, %s107_s25  ;;  %p111_p9 = scmp.lt.u32.totalorder %s107_s25, %s212_s1 }
  0x16   :  { %p113_p10 = pnand %p111_p9, %p108_p8 }
  0x18   :  { %116 = shalt.err (!%p113_p10)
}
  0x19   :  { %s117_s30 = scalar_lea.vmem %s27_s12, 256  ;;  %p122_p12 = scmp.lt.s32.totalorder %s27_s12, %s27_s12 }
  0x1a   :  { %p118_p11 = scmp.ne.s32.totalorder %s27_s12, %s117_s30  ;;  %p123_p13 = scmp.lt.s32.totalorder %s117_s30, %s117_s30 }
  0x1c   :  { %p124_p0 = por %p123_p13, %p122_p12 }
  0x1e   :  { %p125_p1 = pnand %p124_p0, %p118_p11 }
  0x20   :  { %128 = shalt.err (!%p125_p1)
}
  0x21   :  { %29 = dma.hbm_to_vmem [thread:$0]  %s212_s1, 256, %s27_s12, [#allocation6]  }
  0x22   :  { %151 = dma.done.wait [#allocation3], 256  }
  0x23   :  { %152 = vsyncadd [#allocation3], 4294967040 }
  0x24   :  { %153 = dma.done.wait [#allocation6], 256  }
  0x25   :  { %154 = vsyncadd [#allocation6], 4294967040  ;;  %v36_v0 = vld [vmem:[#allocation2] sm:$0xff]  ;;  %v38_v1 = vld [vmem:[#allocation5] sm:$0xff]  ;;  %s159_s1 = smov [#allocation7]  }
  0x26   :  { %v37_v2 = vld [vmem:[#allocation2 + $0x8] sm:$0xff]  ;;  %v40_v3 = vsub.f32 %v36_v0, %v38_v1  ;;  %v39_v4 = vld [vmem:[#allocation5 + $0x8] sm:$0xff]  ;;  %s68_s4 = sshll.u32 %s159_s1, 4  ;;  %s69_s4 = int_to_ptr.vmem [resolvable:$true] %s68_s4 }
  0x27   :  { %v41_v5 = vsub.f32 %v37_v2, %v39_v4  ;;  %s129_s5 = scalar_lea.vmem %s69_s4, 256  ;;  %p134_p3 = scmp.lt.s32.totalorder %s69_s4, %s69_s4 }
  0x28   :  { %v42_v6 = vmul.f32 %v40_v3, %v40_v3  ;;  %p130_p2 = scmp.ne.s32.totalorder %s69_s4, %s129_s5  ;;  %p135_p4 = scmp.lt.s32.totalorder %s129_s5, %s129_s5 }
  0x29   :  { %v43_v7 = vmul.f32 %v41_v5, %v41_v5 }
  0x2a   :  { %v44_v8 = vadd.f32 1e-06, %v42_v6  ;;  %p136_p5 = por %p135_p4, %p134_p3 }
  0x2b   :  { %v45_v9 = vadd.f32 1e-06, %v43_v7 }
  0x2c   :  { %81 = vrsqrt.f32 %v44_v8  ;;  %vm48_vm0 = vcmp.eq.f32.partialorder %v44_v8, inf  ;;  %v51_v11 = vand.u32 2147483648, %v44_v8  ;;  %vm50_vm1 = vcmp.eq.f32.partialorder %v44_v8, 0.0  ;;  %p137_p6 = pnand %p136_p5, %p130_p2 }
  0x2d   :  { %83 = vrsqrt.f32 %v45_v9  ;;  %vm55_vm2 = vcmp.eq.f32.partialorder %v45_v9, inf  ;;  %v58_v14 = vand.u32 2147483648, %v45_v9  ;;  %vm57_vm3 = vcmp.eq.f32.partialorder %v45_v9, 0.0 }
  0x36   :  { %v82_v10 = vpop.eup %81 }
  0x37   :  { %v84_v12 = vpop.eup %83  ;;  %v47_v13 = vmul.f32 %v82_v10, %v44_v8 }
  0x38   :  { %v54_v15 = vmul.f32 %v84_v12, %v45_v9 }
  0x39   :  { %v49_v16 = vsel %vm48_vm0, %v44_v8, %v47_v13 }
  0x3a   :  { %v52_v17 = vsel %vm50_vm1, %v51_v11, %v49_v16  ;;  %v56_v18 = vsel %vm55_vm2, %v45_v9, %v54_v15 }
  0x3b   :  { %60 = vst [vmem:[#allocation7] sm:$0xff] %v52_v17  ;;  %v59_v19 = vsel %vm57_vm3, %v58_v14, %v56_v18 }
  0x3c   :  { %61 = vst [vmem:[#allocation7 + $0x8] sm:$0xff] %v59_v19 }
  0x3d   :  { %140 = shalt.err (!%p137_p6)
}
  0x3e   :  { %s141_s8 = scalar_lea.hbm %s213_s2, 256 }
  0x3f   :  { %p142_p7 = scmp.ne.s32.totalorder %s213_s2, %s141_s8  ;;  %p145_p8 = scmp.lt.u32.totalorder %s141_s8, %s213_s2 }
  0x41   :  { %p147_p9 = pnand %p145_p8, %p142_p7 }
  0x43   :  { %150 = shalt.err (!%p147_p9)
}
  0x44   :  { %71 = dma.vmem_to_hbm [thread:$0]  %s69_s4, 256, %s213_s2, [#allocation4]  }
  0x45   :  { %155 = dma.done.wait [#allocation4], 256  }
  0x46   :  { %156 = vsyncadd [#allocation4], 4294967040 }
  0x47   :  { %75 = vsyncpa [#allocation3], 1 }
  0x48   :  { %76 = vsyncpa [#allocation6], 1 }
  0x49   :  { %77 = vsyncpa [#allocation4], 1 }

</bundles_post_ra>
